<compile_context>
chip_gen: v6e
topology: v6e:2x2x1
jax: 0.10.0
libtpu: 0.0.40
codegen_flags: <defaults>
</compile_context>

<pallas_src>
import math

import jax
import jax.numpy as jnp
from jax.experimental import pallas as pl
from jax.experimental.pallas import tpu as pltpu


# ---------------------------------------------------------------------------
# Generic bias-add matmul kernel: (M, K) @ (K, N) + b.  K kept whole
# (resident in VMEM), grid over (M, N) tiles, both parallel.
# ---------------------------------------------------------------------------
def _linear_kernel(x_ref, w_ref, b_ref, o_ref):
    acc = jnp.dot(x_ref[...], w_ref[...], preferred_element_type=jnp.float32)
    o_ref[...] = (acc + b_ref[...]).astype(o_ref.dtype)


def _pick_tile(dim: int, target: int) -> int:
    """Use `target` if it divides `dim`, otherwise the full dim (always legal)."""
    if dim <= target or dim % target != 0:
        return dim
    return target


def _linear(x2d, w, b, out_dtype, *, block_m: int = 256, block_n: int = 512,
            vmem_limit_bytes: int = 48 * 1024 * 1024):
    M, K = x2d.shape
    K2, N = w.shape
    assert K == K2
    tm = _pick_tile(M, block_m)
    tn = _pick_tile(N, block_n)
    return pl.pallas_call(
        _linear_kernel,
        out_shape=jax.ShapeDtypeStruct((M, N), out_dtype),
        grid_spec=pltpu.PrefetchScalarGridSpec(
            num_scalar_prefetch=0,
            grid=(M // tm, N // tn),
            in_specs=[
                pl.BlockSpec((tm, K), lambda i, j: (i, 0)),   # x rows
                pl.BlockSpec((K, tn), lambda i, j: (0, j)),   # W cols
                pl.BlockSpec((1, tn), lambda i, j: (0, j)),   # bias cols
            ],
            out_specs=pl.BlockSpec((tm, tn), lambda i, j: (i, j)),
        ),
        compiler_params=pltpu.CompilerParams(
            dimension_semantics=("parallel", "parallel"),
            vmem_limit_bytes=vmem_limit_bytes),
    )(x2d, w, b)


# ---------------------------------------------------------------------------
# Flash-attention core.  Grid = (B, H, q_blocks, kv_blocks); online softmax
# carried in VMEM scratch across the kv ("arbitrary") axis.
# ---------------------------------------------------------------------------
def _flash_kernel(q_ref, k_ref, v_ref, o_ref, m_sc, l_sc, acc_sc):
    ki = pl.program_id(3)

    @pl.when(ki == 0)
    def _init():
        m_sc[...] = jnp.full(m_sc.shape, -jnp.inf, dtype=jnp.float32)
        l_sc[...] = jnp.zeros(l_sc.shape, dtype=jnp.float32)
        acc_sc[...] = jnp.zeros(acc_sc.shape, dtype=jnp.float32)

    q = q_ref[0, 0]                       # (tq, dh) bf16, 1/sqrt(dh) prefolded
    k = k_ref[0, 0]                       # (tkv, dh) bf16
    v = v_ref[0, 0]                       # (tkv, dh) bf16

    s = jnp.dot(q, k.T, preferred_element_type=jnp.float32)       # (tq, tkv) f32

    m_prev = m_sc[...]
    m_new = jnp.maximum(m_prev, jnp.max(s, axis=-1, keepdims=True))
    alpha = jnp.exp(m_prev - m_new)                                # f32
    # exp in bf16 (EUP bf16 path on v6e/v7x); running sum stays f32.
    p = jnp.exp((s - m_new).astype(jnp.bfloat16))                  # (tq, tkv) bf16
    l_sc[...] = alpha * l_sc[...] + jnp.sum(p, axis=-1, keepdims=True,
                                            dtype=jnp.float32)
    acc_sc[...] = alpha * acc_sc[...] + jnp.dot(
        p, v, preferred_element_type=jnp.float32)                  # (tq, dh) f32
    m_sc[...] = m_new

    @pl.when(ki == pl.num_programs(3) - 1)
    def _finalize():
        o_ref[0, 0] = (acc_sc[...] *
                       pl.reciprocal(l_sc[...], approx=True)).astype(o_ref.dtype)


def _flash_attention(q, k, v, *, block_q: int, block_kv: int,
                     vmem_limit_bytes: int):
    B, H, S, dh = q.shape
    tq = min(block_q, S)
    tkv = min(block_kv, S)
    assert S % tq == 0 and S % tkv == 0, "S must divide evenly into blocks"
    assert tq == S or tq % 8 == 0
    assert tkv == S or tkv % 8 == 0

    q_spec = pl.BlockSpec((1, 1, tq, dh), lambda b, h, qi, ki: (b, h, qi, 0))
    kv_spec = pl.BlockSpec((1, 1, tkv, dh), lambda b, h, qi, ki: (b, h, ki, 0))

    return pl.pallas_call(
        _flash_kernel,
        out_shape=jax.ShapeDtypeStruct((B, H, S, dh), q.dtype),
        grid_spec=pltpu.PrefetchScalarGridSpec(
            num_scalar_prefetch=0,
            grid=(B, H, S // tq, S // tkv),
            in_specs=[q_spec, kv_spec, kv_spec],
            out_specs=pl.BlockSpec((1, 1, tq, dh),
                                   lambda b, h, qi, ki: (b, h, qi, 0)),
            scratch_shapes=[
                pltpu.VMEM((tq, 1), jnp.float32),    # running max m
                pltpu.VMEM((tq, 1), jnp.float32),    # running sum l
                pltpu.VMEM((tq, dh), jnp.float32),   # PV accumulator
            ],
        ),
        compiler_params=pltpu.CompilerParams(
            dimension_semantics=("parallel", "parallel", "parallel", "arbitrary"),
            vmem_limit_bytes=vmem_limit_bytes),
    )(q, k, v)


# ---------------------------------------------------------------------------
# Full SelfAttention forward (unmasked path).
# ---------------------------------------------------------------------------
def self_attention(x, w_qkv, b_qkv, w_out, b_out, *, n_heads: int,
                   block_q: int = 256, block_kv: int = 256,
                   vmem_limit_bytes: int = 48 * 1024 * 1024):
    """Forward pass of SelfAttention (masked=False).

    x: (B, S, D).  w_qkv: (D, 3D), b_qkv: (1, 3D) (nn.Linear weight as
    (in, out)).  w_out: (D, D), b_out: (1, D).

    Note: vmem_limit_bytes default (48 MiB) is safe on v7x's 64 MiB per-TC
    VMEM; on v5e/v6e (128 MiB) it can be raised to ~100 MiB with larger
    block_q/block_kv.
    """
    B, S, D = x.shape
    assert D % n_heads == 0, "d_embed must be divisible by n_heads"
    dh = D // n_heads
    out_dtype = x.dtype

    # Fold the 1/sqrt(d_head) score scale into the Q columns of the in-proj.
    scale = 1.0 / math.sqrt(dh)
    w_in = jnp.asarray(w_qkv, jnp.float32)
    b_in = jnp.asarray(b_qkv, jnp.float32).reshape(1, 3 * D)
    w_in = w_in.at[:, :D].multiply(scale)
    b_in = b_in.at[:, :D].multiply(scale)

    # --- in_proj: one lane-dense matmul over all tokens ---------------------
    x2d = x.reshape(B * S, D).astype(jnp.bfloat16)
    qkv = _linear(x2d, w_in.astype(jnp.bfloat16), b_in, jnp.bfloat16,
                  vmem_limit_bytes=vmem_limit_bytes)              # (B*S, 3D)

    # Split q/k/v and heads (cheap XLA reshapes/transposes outside the kernel).
    qkv = qkv.reshape(B, S, 3, n_heads, dh)
    q = qkv[:, :, 0].transpose(0, 2, 1, 3)                        # (B, H, S, dh)
    k = qkv[:, :, 1].transpose(0, 2, 1, 3)
    v = qkv[:, :, 2].transpose(0, 2, 1, 3)

    # --- flash attention core -----------------------------------------------
    attn = _flash_attention(q, k, v, block_q=block_q, block_kv=block_kv,
                            vmem_limit_bytes=vmem_limit_bytes)    # (B, H, S, dh)

    # --- head merge + out_proj ----------------------------------------------
    merged = attn.transpose(0, 2, 1, 3).reshape(B * S, D)         # (B*S, D) bf16
    w_o = jnp.asarray(w_out, jnp.bfloat16)
    b_o = jnp.asarray(b_out, jnp.float32).reshape(1, D)
    y = _linear(merged, w_o, b_o, out_dtype,
                vmem_limit_bytes=vmem_limit_bytes)                # (B*S, D)
    return y.reshape(B, S, D)


def _reference(x, w_qkv, b_qkv, w_out, b_out, n_heads):
    """Plain-JAX reference mirroring the PyTorch forward (masked=False)."""
    B, S, D = x.shape
    dh = D // n_heads
    qkv = x @ w_qkv + b_qkv[0]
    q, k, v = jnp.split(qkv, 3, axis=-1)
    q = q.reshape(B, S, n_heads, dh).transpose(0, 2, 1, 3)
    k = k.reshape(B, S, n_heads, dh).transpose(0, 2, 1, 3)
    v = v.reshape(B, S, n_heads, dh).transpose(0, 2, 1, 3)
    w = (q @ jnp.swapaxes(k, -1, -2)) / math.sqrt(dh)
    w = jax.nn.softmax(w, axis=-1)
    out = (w @ v).transpose(0, 2, 1, 3).reshape(B, S, D)
    return out @ w_out + b_out[0]


if __name__ == "__main__":
    # Small shapes consistent with the module; S=16 with 8-wide blocks so the
    # multi-block q/kv streaming and the online softmax are actually exercised.
    B, S, D = 2, 16, 32
    n_heads = 4

    key = jax.random.PRNGKey(0)
    kx, kw1, kb1, kw2, kb2 = jax.random.split(key, 5)

    x = jax.random.normal(kx, (B, S, D), dtype=jnp.float32)

    # Deterministic parameter init (Linear weights stored as (in, out)).
    bound1 = 1.0 / math.sqrt(D)
    w_qkv = jax.random.uniform(kw1, (D, 3 * D), jnp.float32, -bound1, bound1)
    b_qkv = jax.random.uniform(kb1, (1, 3 * D), jnp.float32, -bound1, bound1)
    w_out = jax.random.uniform(kw2, (D, D), jnp.float32, -bound1, bound1)
    b_out = jax.random.uniform(kb2, (1, D), jnp.float32, -bound1, bound1)

    y = self_attention(x, w_qkv, b_qkv, w_out, b_out, n_heads=n_heads,
                       block_q=8, block_kv=8)
    y = jax.block_until_ready(y)

    y_ref = _reference(x, w_qkv, b_qkv, w_out, b_out, n_heads)
    assert y.shape == (B, S, D)
    max_err = float(jnp.max(jnp.abs(y - y_ref)))
    # bf16 matmul operands + bf16 exp + approx reciprocal -> looser tolerance
    # than the pure-f32 reference.
    assert jnp.allclose(y, y_ref, atol=3e-2, rtol=3e-2), (
        f"mismatch vs reference (max|err|={max_err})")

    print("KERNEL_OK")
</pallas_src>

<mosaic_0001>
module attributes {stable_mosaic.version = 11 : i64} {
  func.func @_linear_kernel(%arg0: i32, %arg1: i32, %arg2: memref<32x32xbf16, #tpu.memory_space<vmem>>, %arg3: memref<32x96xbf16, #tpu.memory_space<vmem>>, %arg4: memref<1x96xf32, #tpu.memory_space<vmem>>, %arg5: memref<32x96xbf16, #tpu.memory_space<vmem>>) attributes {dimension_semantics = [#tpu.dimension_semantics<parallel>, #tpu.dimension_semantics<parallel>], iteration_bounds = array<i64: 1, 1>, scalar_prefetch = 0 : i64, scratch_operands = 0 : i64, tpu.core_type = #tpu.core_type<tc>, window_params = [{transform_indices = @transform_0, window_bounds = array<i64: 32, 32>}, {transform_indices = @transform_1, window_bounds = array<i64: 32, 96>}, {transform_indices = @transform_2, window_bounds = array<i64: 1, 96>}, {transform_indices = @transform_3, window_bounds = array<i64: 32, 96>}]} {
    %c0 = arith.constant 0 : index
    %c0_0 = arith.constant 0 : index
    %0 = vector.load %arg2[%c0, %c0_0] : memref<32x32xbf16, #tpu.memory_space<vmem>>, vector<32x32xbf16>
    %c0_1 = arith.constant 0 : index
    %c0_2 = arith.constant 0 : index
    %1 = vector.load %arg3[%c0_1, %c0_2] : memref<32x96xbf16, #tpu.memory_space<vmem>>, vector<32x96xbf16>
    %cst = arith.constant dense<0.000000e+00> : vector<32x96xf32>
    %2 = tpu.matmul %0, %1, %cst {dimension_numbers = #tpu.dot_dimension_numbers<[1], [0], [0], [1], [0, 0, 1, 1], [], []>} : vector<32x32xbf16>, vector<32x96xbf16>, vector<32x96xf32> -> vector<32x96xf32>
    %c0_3 = arith.constant 0 : index
    %c0_4 = arith.constant 0 : index
    %3 = vector.load %arg4[%c0_3, %c0_4] : memref<1x96xf32, #tpu.memory_space<vmem>>, vector<1x96xf32>
    %4 = vector.broadcast %3 : vector<1x96xf32> to vector<32x96xf32>
    %5 = arith.addf %2, %4 : vector<32x96xf32>
    %6 = arith.truncf %5 : vector<32x96xf32> to vector<32x96xbf16>
    %c0_5 = arith.constant 0 : index
    %c0_6 = arith.constant 0 : index
    %7 = vector.load %arg5[%c0_5, %c0_6] : memref<32x96xbf16, #tpu.memory_space<vmem>>, vector<32x96xbf16>
    tpu.vector_store %arg5[%c0_5, %c0_6], %6 {strides = array<i32>} : memref<32x96xbf16, #tpu.memory_space<vmem>>, vector<32x96xbf16>,
    return
  }
  func.func @transform_0(%arg0: i32, %arg1: i32) -> (i32, i32) {
    %c0_i32 = arith.constant 0 : i32
    %c0_i32_0 = arith.constant 0 : i32
    return %arg0, %c0_i32 : i32, i32
  }
  func.func @transform_1(%arg0: i32, %arg1: i32) -> (i32, i32) {
    %c0_i32 = arith.constant 0 : i32
    %c0_i32_0 = arith.constant 0 : i32
    return %c0_i32, %arg1 : i32, i32
  }
  func.func @transform_2(%arg0: i32, %arg1: i32) -> (i32, i32) {
    %c0_i32 = arith.constant 0 : i32
    %c0_i32_0 = arith.constant 0 : i32
    return %c0_i32, %arg1 : i32, i32
  }
  func.func @transform_3(%arg0: i32, %arg1: i32) -> (i32, i32) {
    %c0_i32 = arith.constant 0 : i32
    return %arg0, %arg1 : i32, i32
  }
}

</mosaic_0001>

<bundles_post_ra>
// kernel: tpu_custom_call.1
= control target key start
LH: loop header
LB: loop body
LE: loop exit
PB: predicated region body
PF: predicated region fallthrough
CT: control target
= control target key end

     0   :  { %8 = vsyncpa [#allocation3], 0  ;;  %s328_s0 = inlined_call_operand.hbm [shape: bf16[32,32], index: 0, kind: input, shape index: {}]   ;;  %s329_s1 = inlined_call_operand.hbm [shape: bf16[32,96], index: 1, kind: input, shape index: {}]   ;;  %s330_s2 = inlined_call_operand.vmem [shape: f32[1,96], index: 2, kind: input, shape index: {}]   ;;  %s331_s3 = inlined_call_operand.hbm [shape: bf16[32,96], index: 3, kind: output, shape index: {}]  }
   0x1   :  { %9 = vsyncpa [#allocation6], 0 }
   0x2   :  { %10 = vsyncpa [#allocation4], 0  ;;  %s278_s12 = smov [#allocation2]  }
   0x3   :  { %s16_s13 = sshll.u32 %s278_s12, 4  ;;  %s17_s13 = int_to_ptr.vmem [resolvable:$true] %s16_s13 }
   0x4   :  { %s220_s14 = scalar_lea.vmem %s17_s13, 256  ;;  %p225_p1 = scmp.lt.s32.totalorder %s17_s13, %s17_s13 }
   0x5   :  { %p221_p0 = scmp.ne.s32.totalorder %s17_s13, %s220_s14  ;;  %p226_p2 = scmp.lt.s32.totalorder %s220_s14, %s220_s14 }
   0x7   :  { %p227_p3 = por %p226_p2, %p225_p1 }
   0x9   :  { %p228_p4 = pnand %p227_p3, %p221_p0 }
   0xb   :  { %231 = shalt.err (!%p228_p4)
}
   0xc   :  { %s279_s15 = smov 64   ;;  %s280_s16 = smov 4  }
   0xd   :  { %22 = dma.hbm_to_vmem [thread:$0]  %s328_s0, 256, %s17_s13, [#allocation3], %s279_s15, %s279_s15, %s280_s16  }
   0xe   :  { %s281_s19 = smov [#allocation5]  }
   0xf   :  { %s28_s20 = sshll.u32 %s281_s19, 4  ;;  %s29_s20 = int_to_ptr.vmem [resolvable:$true] %s28_s20 }
  0x10   :  { %s240_s21 = scalar_lea.vmem %s29_s20, 256  ;;  %p245_p6 = scmp.lt.s32.totalorder %s29_s20, %s29_s20 }
  0x11   :  { %p241_p5 = scmp.ne.s32.totalorder %s29_s20, %s240_s21  ;;  %p246_p7 = scmp.lt.s32.totalorder %s240_s21, %s240_s21 }
  0x13   :  { %p247_p8 = por %p246_p7, %p245_p6 }
  0x15   :  { %p248_p9 = pnand %p247_p8, %p241_p5 }
  0x17   :  { %251 = shalt.err (!%p248_p9)
}
  0x18   :  { %34 = dma.hbm_to_vmem [thread:$0]  %s329_s1, 256, %s29_s20, [#allocation6], %s279_s15, %s279_s15, %s280_s16  }
  0x19   :  { %272 = dma.done.wait [#allocation3], 256  }
  0x1a   :  { %273 = vsyncadd [#allocation3], 4294967040 }
  0x1b   :  { %274 = dma.done.wait [#allocation6], 256  }
  0x1c   :  { %275 = vsyncadd [#allocation6], 4294967040  ;;  %v208_v0 = vld [vmem:[#allocation5 + $0x8] sm:$0xff]   ;;  %v209_v1 = vld [vmem:[#allocation5] sm:$0xff]   ;;  %vm81_vm0 = vcmask 261120   ;;  %vm153_vm1 = vcmask 781312  }
  0x1d   :  { %195 = vmatprep.subr.bf16.mxu0 %v208_v0  ;;  %v210_v2 = vld [vmem:[#allocation2] sm:$0xff]   ;;  %v211_v3 = vld [vmem:[#allocation2 + $0x8] sm:$0xff]   ;;  %s282_s1 = smov [#allocation7]  }
  0x1e   :  { %196 = vmatpush3.bf16.msra.mxu0 %v208_v0  ;;  %199 = vmatprep.mubr.msk.bf16.mxu0 %vm81_vm0, %v210_v2  ;;  %v176_v4 = vld [vmem:[%s330_s2] ss:$0 sm:$0xff]  ;;  %s163_s25 = sshll.u32 %s282_s1, 4  ;;  %s164_s25 = int_to_ptr.vmem [resolvable:$true] %s163_s25 }
  0x1f   :  { %197 = vmatprep.subr.bf16.mxu0 %v209_v1  ;;  %s252_s2 = scalar_lea.vmem %s164_s25, 256  ;;  %p257_p11 = scmp.lt.s32.totalorder %s164_s25, %s164_s25 }
  0x20   :  { %p253_p10 = scmp.ne.s32.totalorder %s164_s25, %s252_s2  ;;  %p258_p12 = scmp.lt.s32.totalorder %s252_s2, %s252_s2 }
  0x22   :  { %198 = vmatpush3.bf16.msra.mxu0 %v209_v1  ;;  %p259_p13 = por %p258_p12, %p257_p11 }
  0x24   :  { %p260_p0 = pnand %p259_p13, %p253_p10 }
  0x25   :  { %200 = vmatmul.mubr.msk.bf16.vlgmr.msra.gmra.mxu0 %vm81_vm0, %v211_v3 }
  0xe5   :  { %v201_v5 = vpop.f32.mrf.mxu0 }
  0xe6   :  { %v131_v6 = vadd.f32 %v201_v5, %v176_v4 }
  0xe7   :  { %v122_v7 = vpop.f32.mrf.mxu0 }
  0xe8   :  { %v189_v8 = vpack.c.bf16 %v131_v6, %v131_v6  ;;  %v123_v9 = vadd.f32 %v176_v4, %v122_v7 }
  0xe9   :  { %v202_v10 = vpop.f32.mrf.mxu0 }
  0xea   :  { %156 = vst.msk [vmem:[#allocation7 + $0x8] sm:$0xf] %vm153_vm1, %v189_v8  ;;  %v187_v11 = vpack.c.bf16 %v123_v9, %v123_v9  ;;  %v134_v12 = vadd.f32 %v202_v10, %v176_v4 }
  0xeb   :  { %v125_v13 = vpop.f32.mrf.mxu0 }
  0xec   :  { %154 = vst.msk [vmem:[#allocation7] sm:$0xf] %vm153_vm1, %v187_v11  ;;  %v190_v14 = vpack.c.bf16 %v134_v12, %v134_v12  ;;  %v126_v15 = vadd.f32 %v176_v4, %v125_v13 }
  0xee   :  { %157 = vst.msk [vmem:[#allocation7 + $0xc] sm:$0xf] %vm153_vm1, %v190_v14  ;;  %v188_v16 = vpack.c.bf16 %v126_v15, %v126_v15 }
  0xf0   :  { %155 = vst.msk [vmem:[#allocation7 + $0x4] sm:$0xf] %vm153_vm1, %v188_v16 }
  0xf1   :  { %263 = shalt.err (!%p260_p0)
}
  0xf2   :  { %169 = dma.vmem_to_hbm [thread:$0]  %s164_s25, 256, %s331_s3, [#allocation4], %s279_s15, %s279_s15, %s280_s16  }
  0xf3   :  { %276 = dma.done.wait [#allocation4], 256  }
  0xf4   :  { %277 = vsyncadd [#allocation4], 4294967040 }
  0xf5   :  { %173 = vsyncpa [#allocation3], 1 }
  0xf6   :  { %174 = vsyncpa [#allocation6], 1 }
  0xf7   :  { %175 = vsyncpa [#allocation4], 1 }

</bundles_post_ra>
